<compile_context>
chip_gen: v7x
topology: tpu7x:2x2x1
jax: 0.10.0
libtpu: 0.0.40
codegen_flags: <defaults>
</compile_context>

<pallas_src>
import jax
import jax.numpy as jnp
from jax import lax
from jax.experimental import pallas as pl
from jax.experimental.pallas import tpu as pltpu


def _round_up(x, m):
    return ((x + m - 1) // m) * m


def _pick_tile_hw(hw, c, logit_itemsize, *, tile_max=32768, vmem_budget=24 << 20):
    """Largest lane-aligned pixel tile that amortizes per-grid-step overhead
    while keeping the per-step VMEM working set under `vmem_budget` (so
    large-C configs still fit v7x's 64 MiB physical / 32 MiB scoped VMEM)."""
    per_pixel = (
        2 * c * logit_itemsize   # logits block, double-buffered
        + 2 * 4                  # bins block (<= int32), double-buffered
        + 2 * 4                  # (1, T) resident accumulator block
        + 6 * c * 4              # (C, T) f32 temporaries (x, e, log_pred, one_hot, iota, w_sel)
        + 6 * 4                  # (1, T) temporaries (mask, m, denom, contrib, ...)
    )
    cap = max(128, (vmem_budget // per_pixel) // 128 * 128)
    cap = min(cap, max(128, _round_up(int(tile_max), 128)))
    hw128 = _round_up(int(hw), 128)
    if hw128 <= cap:
        return hw128
    n_tiles = -(-hw // cap)
    return _round_up(-(-hw // n_tiles), 128)


def wcel_loss(pred_logit, gt_bins, gt, weight, *, tile_hw_max=32768, core_split=None):
    """Weighted cross-entropy loss (matches the PyTorch WCEL_Loss.forward)."""
    B, C, H, W = pred_logit.shape
    HW = H * W

    # Free, row-major reshapes only — no transpose / pad / upcast pass in HBM.
    logits = pred_logit.reshape(B, C, HW)              # source dtype (e.g. bf16)
    bins = gt_bins.reshape(B, 1, HW)                   # source (narrow) int dtype
    wt = jnp.transpose(weight.astype(jnp.float32))     # (C, C) = W^T

    tile_hw = _pick_tile_hw(HW, C, jnp.dtype(logits.dtype).itemsize,
                            tile_max=tile_hw_max)
    n_tiles = -(-HW // tile_hw)

    # Core-split of the reduction axis: only useful on v7x (2 TCs) when the
    # batch axis alone can't occupy both cores.
    if core_split is None:
        core_split = 2 if (B == 1 and n_tiles >= 2) else 1
    n_split = max(1, min(int(core_split), n_tiles))
    tps = -(-n_tiles // n_split)                       # tiles per split
    need_clamp = n_split * tps > n_tiles

    def tile_index(s, t):
        idx = s * tps + t
        if need_clamp:
            # Clamp so the DMA never reads past the array; the kernel's lane
            # mask (computed from program_ids, not the clamped index) zeroes
            # any contribution from a duplicated tile.
            idx = jnp.minimum(idx, n_tiles - 1)
        return idx

    def kernel(logits_ref, bins_ref, wt_ref, acc_ref):
        s = pl.program_id(0)
        t = pl.program_id(2)

        @pl.when(t == 0)
        def _():
            acc_ref[...] = jnp.zeros_like(acc_ref)

        # Lane-validity mask for the ragged last tile / clamped extra tiles.
        pix0 = (s * tps + t) * tile_hw
        lane = lax.broadcasted_iota(jnp.int32, (1, tile_hw), 1)
        valid = (pix0 + lane) < HW                                   # (1, T)

        x = logits_ref[0].astype(jnp.float32)                        # (C, T)
        x = jnp.where(valid, x, 0.0)          # finite softmax on garbage lanes

        # log_softmax over the class (sublane) axis, fused stabilization.
        m = jnp.max(x, axis=0, keepdims=True)                        # (1, T)
        e = jnp.exp(x - m)
        denom = m + jnp.log(jnp.sum(e, axis=0, keepdims=True))       # (1, T)
        log_pred = x - denom                                         # (C, T)

        bins_i = bins_ref[0].astype(jnp.int32)                       # (1, T)
        g_iota = lax.broadcasted_iota(jnp.int32, (C, tile_hw), 0)    # (C, T)
        one_hot = jnp.logical_and(bins_i == g_iota, valid).astype(jnp.float32)

        # w_sel[c, p] = W[bins[p], c] = (W^T @ one_hot)[c, p]
        # Native NN matmul on the MXU: no operand transpose, lane-dense output.
        w_sel = lax.dot_general(
            wt_ref[...], one_hot,
            dimension_numbers=(((1,), (0,)), ((), ())),
            precision=lax.Precision.HIGHEST,
            preferred_element_type=jnp.float32)                      # (C, T)

        contrib = jnp.sum(w_sel * log_pred, axis=0, keepdims=True)   # (1, T)
        acc_ref[...] = acc_ref[...] + contrib[None, None]

    acc = pl.pallas_call(
        kernel,
        out_shape=jax.ShapeDtypeStruct((n_split, B, 1, tile_hw), jnp.float32),
        grid=(n_split, B, tps),
        in_specs=[
            pl.BlockSpec((1, C, tile_hw), lambda s, b, t: (b, 0, tile_index(s, t))),
            pl.BlockSpec((1, 1, tile_hw), lambda s, b, t: (b, 0, tile_index(s, t))),
            pl.BlockSpec((C, C), lambda s, b, t: (0, 0)),
        ],
        out_specs=pl.BlockSpec((1, 1, 1, tile_hw), lambda s, b, t: (s, b, 0, 0)),
        compiler_params=pltpu.CompilerParams(
            dimension_semantics=("parallel", "parallel", "arbitrary"),
            vmem_limit_bytes=32 * 1024 * 1024),
    )(logits, bins, wt)

    weighted_sum = jnp.sum(acc)
    valid_pixels = jnp.sum(gt > 0.0).astype(jnp.float32)   # trivial XLA reduce
    # TODO(synk): division yields inf/nan if no gt>0 pixel exists (same as the
    # PyTorch reference); guard with jnp.maximum(valid_pixels, 1) in production.
    return -weighted_sum / valid_pixels


def wcel_loss_ref(pred_logit, gt_bins, gt, weight):
    """Pure-JAX reference mirroring the PyTorch code exactly."""
    B, C, H, W = pred_logit.shape
    log_pred = jax.nn.log_softmax(pred_logit.astype(jnp.float32), axis=1)
    log_pred = jnp.transpose(log_pred, (0, 2, 3, 1)).reshape(-1, C)
    classes_range = jnp.arange(C, dtype=gt_bins.dtype)
    one_hot = (gt_bins.reshape(-1, 1) == classes_range).astype(jnp.float32)
    w = one_hot @ weight.astype(jnp.float32)
    valid_pixels = jnp.sum(gt > 0.0).astype(jnp.float32)
    return -jnp.sum(w * log_pred) / valid_pixels


if __name__ == "__main__":
    # Small shapes consistent with the module:
    #   pred_logit: (B, C, H, W) with C = DECODER_OUTPUT_C
    #   gt_bins:    (B, H, W) integer bin labels in [0, C)
    #   gt:         (B, H, W) depth values; valid where > 0
    # W = 15 makes HW = 240 (not a multiple of 128) so the ragged-tile lane
    # mask is exercised without any wrapper-side padding.
    B, C, H, W = 2, 8, 16, 15

    key = jax.random.PRNGKey(0)
    k1, k2, k3 = jax.random.split(key, 3)

    pred_logit = jax.random.normal(k1, (B, C, H, W), dtype=jnp.float32)
    gt_bins = jax.random.randint(k2, (B, H, W), 0, C, dtype=jnp.int32)
    # some invalid (<= 0) pixels
    gt = jax.random.uniform(k3, (B, H, W), dtype=jnp.float32,
                            minval=-0.5, maxval=1.5)

    # Deterministic synthetic WCE weight matrix (cfg.DATASET.WCE_LOSS_WEIGHT):
    # Gaussian band around the diagonal, row-normalized (as in __init__).
    idx = jnp.arange(C, dtype=jnp.float32)
    wce_weight = jnp.exp(-0.5 * ((idx[:, None] - idx[None, :]) / 2.0) ** 2)
    wce_weight = wce_weight / jnp.sum(wce_weight, axis=1, keepdims=True)

    loss = jax.block_until_ready(wcel_loss(pred_logit, gt_bins, gt, wce_weight))
    loss_ref = jax.block_until_ready(
        wcel_loss_ref(pred_logit, gt_bins, gt, wce_weight))

    assert jnp.isfinite(loss), f"non-finite loss: {loss}"
    assert jnp.allclose(loss, loss_ref, rtol=1e-4, atol=1e-4), (
        f"mismatch: pallas={loss} ref={loss_ref}")
    print("KERNEL_OK")
</pallas_src>

<mosaic_0001>
module attributes {stable_mosaic.version = 11 : i64} {
  func.func @kernel(%arg0: i32, %arg1: i32, %arg2: i32, %arg3: memref<1x8x256xf32, #tpu.memory_space<vmem>>, %arg4: memref<1x1x256xi32, #tpu.memory_space<vmem>>, %arg5: memref<8x8xf32, #tpu.memory_space<vmem>>, %arg6: memref<1x1x1x256xf32, #tpu.memory_space<vmem>>) attributes {dimension_semantics = [#tpu.dimension_semantics<parallel>, #tpu.dimension_semantics<parallel>, #tpu.dimension_semantics<arbitrary>], iteration_bounds = array<i64: 1, 2, 1>, scalar_prefetch = 0 : i64, scratch_operands = 0 : i64, tpu.core_type = #tpu.core_type<tc>, window_params = [{transform_indices = @transform_0, window_bounds = array<i64: 1, 8, 256>}, {transform_indices = @transform_1, window_bounds = array<i64: 1, 1, 256>}, {pipeline_mode = #tpu.pipeline_mode<synchronous>, transform_indices = @transform_2, window_bounds = array<i64: 8, 8>}, {transform_indices = @transform_3, window_bounds = array<i64: 1, 1, 1, 256>}]} {
    %c0_i32 = arith.constant 0 : i32
    %0 = arith.cmpi eq, %arg2, %c0_i32 : i32
    %1 = arith.extui %0 : i1 to i32
    %c0_i32_0 = arith.constant 0 : i32
    %2 = arith.cmpi ne, %1, %c0_i32_0 : i32
    scf.if %2 {
      %cst_20 = arith.constant 0.000000e+00 : f32
      %46 = vector.broadcast %cst_20 : f32 to vector<1x1x1x256xf32>
      %c0_21 = arith.constant 0 : index
      %c0_22 = arith.constant 0 : index
      %c0_23 = arith.constant 0 : index
      %c0_24 = arith.constant 0 : index
      %47 = vector.load %arg6[%c0_21, %c0_22, %c0_23, %c0_24] : memref<1x1x1x256xf32, #tpu.memory_space<vmem>>, vector<1x1x1x256xf32>
      tpu.vector_store %arg6[%c0_21, %c0_22, %c0_23, %c0_24], %46 {strides = array<i32>} : memref<1x1x1x256xf32, #tpu.memory_space<vmem>>, vector<1x1x1x256xf32>,
    } else {
    }
    %c1_i32 = arith.constant 1 : i32
    %3 = arith.muli %arg0, %c1_i32 : i32
    %4 = arith.addi %3, %arg2 : i32
    %c256_i32 = arith.constant 256 : i32
    %5 = arith.muli %4, %c256_i32 : i32
    %6 = tpu.iota {dimensions = array<i32: 1>} : vector<1x256xi32>
    %7 = vector.broadcast %5 : i32 to vector<1x256xi32>
    %8 = arith.addi %7, %6 : vector<1x256xi32>
    %c240_i32 = arith.constant 240 : i32
    %9 = vector.broadcast %c240_i32 : i32 to vector<1x256xi32>
    %10 = arith.cmpi slt, %8, %9 : vector<1x256xi32>
    %c0 = arith.constant 0 : index
    %c0_1 = arith.constant 0 : index
    %c0_2 = arith.constant 0 : index
    %11 = vector.load %arg3[%c0, %c0_1, %c0_2] : memref<1x8x256xf32, #tpu.memory_space<vmem>>, vector<1x8x256xf32>
    %12 = vector.shape_cast %11 : vector<1x8x256xf32> to vector<8x256xf32>
    %cst = arith.constant 0.000000e+00 : f32
    %13 = vector.shape_cast %10 : vector<1x256xi1> to vector<1x256xi1>
    %14 = vector.broadcast %13 : vector<1x256xi1> to vector<8x256xi1>
    %15 = vector.broadcast %cst : f32 to vector<8x256xf32>
    %16 = arith.select %14, %12, %15 : vector<8x256xi1>, vector<8x256xf32>
    %cst_3 = arith.constant dense<0xFF800000> : vector<256xf32>
    %17 = vector.multi_reduction <maximumf>, %16, %cst_3 [0] : vector<8x256xf32> to vector<256xf32>
    %18 = vector.shape_cast %17 : vector<256xf32> to vector<1x256xf32>
    %19 = vector.broadcast %18 : vector<1x256xf32> to vector<8x256xf32>
    %20 = arith.subf %16, %19 : vector<8x256xf32>
    %21 = math.exp %20 : vector<8x256xf32>
    %cst_4 = arith.constant dense<0.000000e+00> : vector<256xf32>
    %22 = vector.multi_reduction <add>, %21, %cst_4 [0] : vector<8x256xf32> to vector<256xf32>
    %23 = vector.shape_cast %22 : vector<256xf32> to vector<1x256xf32>
    %24 = math.log %23 : vector<1x256xf32>
    %25 = arith.addf %18, %24 : vector<1x256xf32>
    %26 = vector.broadcast %25 : vector<1x256xf32> to vector<8x256xf32>
    %27 = arith.subf %16, %26 : vector<8x256xf32>
    %c0_5 = arith.constant 0 : index
    %c0_6 = arith.constant 0 : index
    %c0_7 = arith.constant 0 : index
    %28 = vector.load %arg4[%c0_5, %c0_6, %c0_7] : memref<1x1x256xi32, #tpu.memory_space<vmem>>, vector<1x1x256xi32>
    %29 = vector.shape_cast %28 : vector<1x1x256xi32> to vector<1x256xi32>
    %30 = tpu.iota {dimensions = array<i32: 0>} : vector<8x256xi32>
    %31 = vector.broadcast %29 : vector<1x256xi32> to vector<8x256xi32>
    %32 = arith.cmpi eq, %31, %30 : vector<8x256xi32>
    %33 = vector.broadcast %10 : vector<1x256xi1> to vector<8x256xi1>
    %34 = arith.andi %32, %33 : vector<8x256xi1>
    %35 = arith.extui %34 : vector<8x256xi1> to vector<8x256xi32>
    %36 = arith.sitofp %35 : vector<8x256xi32> to vector<8x256xf32>
    %c0_8 = arith.constant 0 : index
    %c0_9 = arith.constant 0 : index
    %37 = vector.load %arg5[%c0_8, %c0_9] : memref<8x8xf32, #tpu.memory_space<vmem>>, vector<8x8xf32>
    %cst_10 = arith.constant dense<0.000000e+00> : vector<8x256xf32>
    %38 = tpu.matmul %37, %36, %cst_10 {dimension_numbers = #tpu.dot_dimension_numbers<[1], [0], [0], [1], [0, 0, 1, 1], [], []>, precision = #tpu.contract_precision<fp32>} : vector<8x8xf32>, vector<8x256xf32>, vector<8x256xf32> -> vector<8x256xf32>
    %39 = arith.mulf %38, %27 : vector<8x256xf32>
    %cst_11 = arith.constant dense<0.000000e+00> : vector<256xf32>
    %40 = vector.multi_reduction <add>, %39, %cst_11 [0] : vector<8x256xf32> to vector<256xf32>
    %41 = vector.shape_cast %40 : vector<256xf32> to vector<1x256xf32>
    %c0_12 = arith.constant 0 : index
    %c0_13 = arith.constant 0 : index
    %c0_14 = arith.constant 0 : index
    %c0_15 = arith.constant 0 : index
    %42 = vector.load %arg6[%c0_12, %c0_13, %c0_14, %c0_15] : memref<1x1x1x256xf32, #tpu.memory_space<vmem>>, vector<1x1x1x256xf32>
    %43 = vector.shape_cast %41 : vector<1x256xf32> to vector<1x1x1x256xf32>
    %44 = arith.addf %42, %43 : vector<1x1x1x256xf32>
    %c0_16 = arith.constant 0 : index
    %c0_17 = arith.constant 0 : index
    %c0_18 = arith.constant 0 : index
    %c0_19 = arith.constant 0 : index
    %45 = vector.load %arg6[%c0_16, %c0_17, %c0_18, %c0_19] : memref<1x1x1x256xf32, #tpu.memory_space<vmem>>, vector<1x1x1x256xf32>
    tpu.vector_store %arg6[%c0_16, %c0_17, %c0_18, %c0_19], %44 {strides = array<i32>} : memref<1x1x1x256xf32, #tpu.memory_space<vmem>>, vector<1x1x1x256xf32>,
    return
  }
  func.func @transform_0(%arg0: i32, %arg1: i32, %arg2: i32) -> (i32, i32, i32) {
    %c1_i32 = arith.constant 1 : i32
    %0 = arith.muli %arg0, %c1_i32 : i32
    %1 = arith.addi %0, %arg2 : i32
    %c0_i32 = arith.constant 0 : i32
    %c0_i32_0 = arith.constant 0 : i32
    return %arg1, %c0_i32, %1 : i32, i32, i32
  }
  func.func @transform_1(%arg0: i32, %arg1: i32, %arg2: i32) -> (i32, i32, i32) {
    %c1_i32 = arith.constant 1 : i32
    %0 = arith.muli %arg0, %c1_i32 : i32
    %1 = arith.addi %0, %arg2 : i32
    %c0_i32 = arith.constant 0 : i32
    %c0_i32_0 = arith.constant 0 : i32
    return %arg1, %c0_i32, %1 : i32, i32, i32
  }
  func.func @transform_2(%arg0: i32, %arg1: i32, %arg2: i32) -> (i32, i32) {
    %c0_i32 = arith.constant 0 : i32
    %c0_i32_0 = arith.constant 0 : i32
    %c0_i32_1 = arith.constant 0 : i32
    return %c0_i32, %c0_i32_0 : i32, i32
  }
  func.func @transform_3(%arg0: i32, %arg1: i32, %arg2: i32) -> (i32, i32, i32, i32) {
    %c0_i32 = arith.constant 0 : i32
    %c0_i32_0 = arith.constant 0 : i32
    %c0_i32_1 = arith.constant 0 : i32
    return %arg0, %arg1, %c0_i32, %c0_i32_0 : i32, i32, i32, i32
  }
}

</mosaic_0001>

<bundles_post_ra>
// kernel: tpu_custom_call.1
= control target key start
LH: loop header
LB: loop body
LE: loop exit
PB: predicated region body
PF: predicated region fallthrough
CT: control target
= control target key end

     0   :  { %s1664_s0 = inlined_call_operand.hbm [shape: f32[2,8,240], index: 0, kind: input, shape index: {}]   ;;  %s1665_s1 = inlined_call_operand.hbm [shape: s32[2,1,240], index: 1, kind: input, shape index: {}]   ;;  %s1666_s2 = inlined_call_operand.hbm [shape: f32[8,8], index: 2, kind: input, shape index: {}]   ;;  %s1667_s3 = inlined_call_operand.hbm [shape: f32[1,2,1,256], index: 3, kind: output, shape index: {}]  }
   0x1   :  { %1672 = sst [smem:[#allocation13_spill]] %s1664_s0 }
   0x2   :  { %8 = vsyncpa [#allocation3], 0 }
   0x3   :  { %10 = vsyncpa [#allocation3 + $0x1], 0 }
   0x4   :  { %11 = vsyncpa [#allocation6], 0 }
   0x5   :  { %13 = vsyncpa [#allocation6 + $0x1], 0 }
   0x6   :  { %14 = vsyncpa [#allocation4], 0 }
   0x7   :  { %16 = vsyncpa [#allocation4 + $0x1], 0  ;;  %s1348_s12 = smov 0   ;;  %s1350_s13 = smov 0  }
   0x8   :  { %s1352_s14 = smov 0   ;;  %s1354_s15 = smov 0  }
   0x9   :  { %s1356_s16 = smov 0   ;;  %s1358_s17 = smov 0  }
   0xa LB: > { %s1379_s18 = sadd.s32 4294967295, %s1319_s17   ;;  %s1011_s19 = sadd.s32 4294967294, %s1319_s17   ;;  %s1319_s17 = sphi %s1358_s17, %s22_s17   ;;  %s1315_s16 = sphi %s1356_s16, %s1700_s16   ;;  %s1311_s15 = sphi %s1354_s15, %s1699_s15   ;;  %s1307_s14 = sphi %s1352_s14, %s1698_s14   ;;  %s1303_s13 = sphi %s1350_s13, %s1697_s13   ;;  %s1299_s12 = sphi %s1348_s12, %s1696_s12  }
   0xb   : > { %s52_s20 = sadd.s32 1, %s1307_s14  ;;  %p59_p0 = scmp.ne.s32.totalorder %s1307_s14, %s1303_s13 }
   0xc   : > { %p65_p1 = scmp.ne.s32.totalorder %s1303_s13, %s1299_s12  ;;  %p1668_p2 = scmp.eq.s32.totalorder %s1379_s18, 0 }
   0xd   : > { %p142_p3 = scmp.eq.s32.totalorder %s1379_s18, 1  ;;  %p148_p4 = scmp.eq.s32.totalorder %s1011_s19, 1 }
   0xe   : > { %p1391_p5 = por %p1668_p2, %p65_p1  ;;  %p1012_p6 = scmp.ge.s32.totalorder %s1319_s17, 1 }
   0xf   : > { %p1399_p7 = por %p142_p3, %p59_p0  ;;  %p1403_p8 = por %p148_p4, %p65_p1 }
  0x10   : > { %s1673_s21 = scalar_select %p1391_p5, 1, 0 }
  0x11   : > { %s1674_s22 = scalar_select %p1399_p7, 1, 0 }
  0x12   : > { %s1675_s23 = scalar_select %p1403_p8, 1, 0 }
  0x13   : > { %p155_p9 = scmp.lt.s32.totalorder %s1319_s17, 3  ;;  %s1321_s25 = smov [#allocation7]  }
  0x14   : > { %s168_s26 = sshll.u32 %s1321_s25, 4  ;;  %s37_s27 = sadd.s32 1, %s1315_s16  ;;  %s169_s26 = int_to_ptr.vmem [resolvable:$true] %s168_s26 }
  0x15   : > { %p1409_p11 = pnand %p1012_p6, %p155_p9  ;;  %p60_p13 = scmp.eq.s32.totalorder %s1319_s17, 0 }
  0x16   : > { %p1423_p1 = scmp.ge.s32.totalorder %s37_s27, 2  ;;  %s1436_s4 = sand.u32 1, %s1307_s14  }
  0x17   : > { %s1676_s24 = scalar_select %p1409_p11, 1, 0 }
  0x18   : > { %p1062_p12 = pneg %p1409_p11  ;;  %p1430_p4 = por %p60_p13, %p59_p0 }
  0x19   : > { %s1678_s29 = scalar_select %p1423_p1, 1, 0 }
  0x1a   : > { %p1419_p3 = pnand %p1062_p12, %p1668_p2  ;;  %s1141_s7 = scalar_lea.hbm %s1666_s2, 128 }
  0x1b   : > { %s1679_s30 = scalar_select %p1430_p4, 1, 0 }
  0x1c   : > { %p1142_p9 = scmp.ne.s32.totalorder %s1666_s2, %s1141_s7  ;;  %p1143_p12 = pneg %p1419_p3 }
  0x1d   : > { %p1148_p0 = scmp.lt.u32.totalorder %s1141_s7, %s1666_s2 }
  0x1e   : > { %p1144_p10 = pnand %p1143_p12, %p1142_p9 }
  0x20   : > { %p1145_p2 = pneg %p1144_p10 }
  0x22   : > { %p1150_p13 = pnand %p1148_p0, %p1145_p2 }
  0x24   : > { %1153 = shalt.err (!%p1150_p13)
}
  0x25   : > { %s1154_s19 = scalar_lea.vmem %s169_s26, 128  ;;  %p1162_p5 = scmp.lt.s32.totalorder %s169_s26, %s169_s26 }
  0x26   : > { %p1155_p6 = scmp.ne.s32.totalorder %s169_s26, %s1154_s19  ;;  %p1163_p11 = scmp.lt.s32.totalorder %s1154_s19, %s1154_s19 }
  0x28   : > { %p1157_p8 = pnand %p1155_p6, %p1143_p12  ;;  %p1164_p4 = por %p1163_p11, %p1162_p5 }
  0x2a   : > { %p1158_p7 = pneg %p1157_p8 }
  0x2c   : > { %p1165_p1 = pnand %p1164_p4, %p1158_p7 }
  0x2e   : > { %1168 = shalt.err (!%p1165_p1)
}
  0x2f   : > { %1065 = dma.hbm_to_vmem [thread:$0]  (!%p1419_p3), %s1666_s2, 128, %s169_s26, [#allocation6]  }
  0x30   : > { %p1680_p2 = scmp.ne.s32.totalorder %s1678_s29, 0  ;;  %s1015_s28 = sshll.u32 %s1436_s4, 4 }
  0x31   : > { %s1039_s7 = sshll.u32 %s1315_s16, 8  ;;  %s1681_s0 = sld [smem:[#allocation13_spill]] }
  0x32   : > { %s1702_s27 = smov (%p1680_p2, %s37_s27), 0  ;;  %s183_s11 = scalar_lea.vmem [#allocation2], %s1015_s28 }
  0x33   : > { %s47_s6 = ssub.s32 %s1315_s16, %s1702_s27  ;;  %s194_s19 = sshll.u32 %s183_s11, 4  ;;  %s1472_s19 = int_to_ptr.vmem [resolvable:$true] %s194_s19 }
  0x34   : > { %p50_p5 = scmp.eq.s32.totalorder %s47_s6, 0  ;;  %p1682_p7 = scmp.ne.s32.totalorder %s1679_s30, 0 }
  0x35   : > { %p1683_p8 = scmp.lt.s32.totalorder %s1319_s17, 2  ;;  %s201_s25 = sand.u32 1, %s1319_s17  }
  0x36   : > { %s1470_s26 = scalar_select %p50_p5, %s1307_s14, %s52_s20  }
  0x37   : > { %s1465_s10 = scalar_lea.hbm %s1681_s0, %s1039_s7  ;;  %p1478_p10 = pnand %p1683_p8, %p1682_p7 }
  0x38   : > { %s1018_s5 = sshll.u32 %s1436_s4, 1  ;;  %s180_s6 = scalar_lea.sflag [#allocation3], %s1436_s4 }
  0x39   : > { %s1169_s7 = scalar_lea.hbm %s1465_s10, 256  ;;  %p1171_p3 = pneg %p1478_p10 }
  0x3a   : > { %p1170_p11 = scmp.ne.s32.totalorder %s1465_s10, %s1169_s7  ;;  %s1174_s28 = scalar_lea.hbm %s1681_s0, 512 }
  0x3b   : > { %p1175_p6 = scmp.lt.u32.totalorder %s1465_s10, %s1681_s0  ;;  %p1176_p9 = scmp.lt.u32.totalorder %s1174_s28, %s1169_s7 }
  0x3c   : > { %p1172_p1 = pnand %p1171_p3, %p1170_p11  ;;  %p1178_p0 = scmp.lt.u32.totalorder %s1169_s7, %s1465_s10 }
  0x3d   : > { %p1177_p12 = por %p1176_p9, %p1175_p6 }
  0x3e   : > { %p1173_p4 = pneg %p1172_p1 }
  0x3f   : > { %p1179_p13 = por %p1178_p0, %p1177_p12 }
  0x41   : > { %p1180_p2 = pnand %p1179_p13, %p1173_p4 }
  0x43   : > { %1183 = shalt.err (!%p1180_p2)
}
  0x44   : > { %s1184_s11 = scalar_lea.vmem %s1472_s19, 256  ;;  %s1322_s20 = smov [#allocation2]  }
  0x45   : > { %p1185_p5 = scmp.ne.s32.totalorder %s1472_s19, %s1184_s11  ;;  %s1189_s30 = sshll.u32 %s1322_s20, 4  ;;  %s1190_s30 = int_to_ptr.vmem [resolvable:$false] %s1189_s30 }
  0x46   : > { %s1191_s8 = scalar_lea.vmem %s1190_s30, 512  ;;  %p1192_p11 = scmp.lt.s32.totalorder %s1472_s19, %s1190_s30 }
  0x47   : > { %p1187_p7 = pnand %p1185_p5, %p1171_p3  ;;  %p1193_p1 = scmp.lt.s32.totalorder %s1191_s8, %s1184_s11 }
  0x49   : > { %p1188_p8 = pneg %p1187_p7  ;;  %p1194_p6 = por %p1193_p1, %p1192_p11 }
  0x4b   : > { %p1195_p9 = pnand %p1194_p6, %p1188_p8 }
  0x4d   : > { %1198 = shalt.err (!%p1195_p9)
}
  0x4e   : > { %1069 = dma.hbm_to_vmem [thread:$0]  (!%p1478_p10), %s1465_s10, 256, %s1472_s19, %s180_s6  }
  0x4f   : > { %s1040_s7 = sshll.u32 %s1315_s16, 5  ;;  %s205_s11 = scalar_lea.vmem [#allocation5], %s1018_s5 }
  0x50   : > { %s1514_s20 = scalar_lea.hbm %s1665_s1, %s1040_s7  ;;  %s216_s30 = sshll.u32 %s205_s11, 4  ;;  %s217_s30 = int_to_ptr.vmem [resolvable:$true] %s216_s30 }
  0x51   : > { %s202_s8 = scalar_lea.sflag [#allocation6], %s201_s25  ;;  %s1199_s0 = scalar_lea.hbm %s1514_s20, 32 }
  0x52   : > { %p1200_p4 = scmp.ne.s32.totalorder %s1514_s20, %s1199_s0  ;;  %s1204_s6 = scalar_lea.hbm %s1665_s1, 64 }
  0x53   : > { %p1205_p13 = scmp.lt.u32.totalorder %s1514_s20, %s1665_s1  ;;  %p1206_p2 = scmp.lt.u32.totalorder %s1204_s6, %s1199_s0 }
  0x54   : > { %p1202_p12 = pnand %p1200_p4, %p1171_p3  ;;  %p1208_p7 = scmp.lt.u32.totalorder %s1199_s0, %s1514_s20 }
  0x55   : > { %p1207_p5 = por %p1206_p2, %p1205_p13 }
  0x56   : > { %p1203_p0 = pneg %p1202_p12 }
  0x57   : > { %p1209_p8 = por %p1208_p7, %p1207_p5 }
  0x59   : > { %p1210_p11 = pnand %p1209_p8, %p1203_p0 }
  0x5b   : > { %1213 = shalt.err (!%p1210_p11)
}
  0x5c   : > { %s1214_s25 = scalar_lea.vmem %s217_s30, 32  ;;  %s1323_s5 = smov [#allocation5]  }
  0x5d   : > { %p1215_p1 = scmp.ne.s32.totalorder %s217_s30, %s1214_s25  ;;  %s1219_s28 = sshll.u32 %s1323_s5, 4  ;;  %s1220_s28 = int_to_ptr.vmem [resolvable:$false] %s1219_s28 }
  0x5e   : > { %s1221_s9 = scalar_lea.vmem %s1220_s28, 64  ;;  %p1222_p4 = scmp.lt.s32.totalorder %s217_s30, %s1220_s28 }
  0x5f   : > { %p1217_p6 = pnand %p1215_p1, %p1171_p3  ;;  %p1223_p12 = scmp.lt.s32.totalorder %s1221_s9, %s1214_s25 }
  0x61   : > { %p1218_p9 = pneg %p1217_p6  ;;  %p1224_p2 = por %p1223_p12, %p1222_p4 }
  0x63   : > { %p1225_p13 = pnand %p1224_p2, %p1218_p9 }
  0x65   : > { %1228 = shalt.err (!%p1225_p13)
}
  0x66   : > { %1072 = dma.hbm_to_vmem [thread:$0]  (!%p1478_p10), %s1514_s20, 32, %s217_s30, %s202_s8  }
  0x67   : > { %p1685_p0 = scmp.ne.s32.totalorder %s1676_s24, 0 }
  0x68   : > { %s1542_s0 = sand.u32 (!%p1685_p0), 1, %s1303_s13   ;;  %p1686_p3 = scmp.ne.s32.totalorder (!%p1685_p0), %s1673_s21, 0 }
  0x69   : > { %225 = sbr.rel (%p1685_p0) target bundleno = 400 (0x190), region = 32  ;;  %s1022_s11 = sshll.u32 (!%p1685_p0), %s1542_s0, 4 }
  0x6a   : > { %s228_s10 = scalar_lea.sflag (!%p1685_p0), [#allocation3], %s1542_s0  ;;  %s1546_s19 = scalar_lea.vmem (!%p1685_p0), [#allocation2], %s1022_s11 }
  0x70   : > { %1282 = dma.done.wait (%p1686_p3), %s228_s10, 256  }
  0x71   : > { %1284 = vsyncadd (%p1686_p3), %s228_s10, 4294967040  ;;  %s236_s24 = sand.u32 1, %s1379_s18   ;;  %s1023_s29 = sshll.u32 %s1542_s0, 1 }
  0x72   : > { %s237_s20 = scalar_lea.sflag [#allocation6], %s236_s24  ;;  %s240_s30 = scalar_lea.vmem [#allocation5], %s1023_s29 }
  0x73   : > { %1286 = dma.done.wait (%p1686_p3), %s237_s20, 32  }
  0x74   : > { %1288 = vsyncadd (%p1686_p3), %s237_s20, 4294967264  ;;  %p1687_p10 = scmp.eq.s32.totalorder %s1379_s18, 0 }
  0x76   : > { %1290 = dma.done.wait (%p1687_p10), [#allocation6], 128   ;;  %p1688_p5 = pmov %p1687_p10 }
  0x77   : > { %v280_v0 = vlaneseq  ;;  %v1324_v1 = vmov 0.0   ;;  %vm361_vm0 = vcmask 64512   ;;  %v341_v7 = vld [vmem:[%s240_s30] sm:$0x3]  ;;  %v360_v8 = vld [vmem:[#allocation7] sm:$0xff]  ;;  %v1325_v17 = vmov 1.0  }
  0x78   : > { %1292 = vsyncadd (%p1688_p5), [#allocation6], 4294967168  ;;  %668 = vmatprep.mubr.f32.mxu0 %v1324_v1  ;;  %431 = vmatprep.mubr.f32.mxu1 %v1324_v1  ;;  %v363_v11 = vsel %vm361_vm0, %v360_v8, 0  ;;  %s1597_s18 = scalar_lea.vmem [#allocation8], %s1023_s29  ;;  %v296_v30 = vld [vmem:[%s1546_s19 + $0x8] sm:$0xff]  ;;  %v295_v31 = vld [vmem:[%s1546_s19] sm:$0xff] }
  0x79   : > { %v288_v2 = vand.u32 127, %v280_v0  ;;  %v1564_v3 = vshrl.u32 %v280_v0, 7  ;;  %v432_v12 = vand.u32 4294901760, %v363_v11  ;;  %vm1591_vm5 = vcmp.lt.s32.totalorder %v280_v0, 256  ;;  %s1041_s21 = sshll.u32 %s1311_s15, 5  ;;  %s886_s8 = sshll.u32 %s1597_s18, 4  ;;  %s1614_s8 = int_to_ptr.vmem [resolvable:$true] %s886_s8 }
  0x7a   : > { %284 = vst.msk [vmem:[%s1597_s18] sm:$0x3] %vm1591_vm5, %v1324_v1  ;;  %v303_v33 = vrot.slane %v295_v31, 4  ;;  %s1612_s7 = scalar_lea.hbm %s1667_s3, %s1041_s21  ;;  %s870_s25 = scalar_lea.sflag [#allocation4], %s1542_s0 }
  0x7b   : > { %v289_v4 = vadd.s32 128, %v288_v2  ;;  %v350_v5 = vsub.s32 1, %v1564_v3  ;;  %v346_v6 = vsub.s32 0, %v1564_v3  ;;  %v433_v15 = vsub.f32 %v363_v11, %v432_v12  ;;  %s1229_s5 = scalar_lea.vmem %s1614_s8, 32  ;;  %p1693_p8 = scmp.ne.s32.totalorder %s1674_s22, 0 }
  0x7c   : > { %v304_v35 = vmax.f32 %v295_v31, %v303_v33  ;;  %p1230_p7 = scmp.ne.s32.totalorder %s1614_s8, %s1229_s5  ;;  %s1327_s15 = smov [#allocation8]  }
  0x7d   : > { %vm294_vm1 = vcmp.lt.s32.totalorder %v289_v4, 240  ;;  %v351_v9 = vrot.slane %v341_v7, %v350_v5  ;;  %v347_v10 = vrot.slane %v341_v7, %v346_v6  ;;  %v434_v20 = vand.u32 4294901760, %v433_v15  ;;  %s1233_s28 = sshll.u32 %s1327_s15, 4  ;;  %s1234_s28 = int_to_ptr.vmem [resolvable:$false] %s1233_s28 }
  0x7e   : > { %v302_v32 = vsel %vm294_vm1, %v296_v30, 0.0  ;;  %v305_v37 = vrot.slane %v304_v35, 2  ;;  %p1231_p11 = pnand %p1230_p7, %p1693_p8  ;;  %s1235_s9 = scalar_lea.vmem %s1234_s28, 64 }
  0x7f   : > { %vm353_vm2 = vcmp.eq.s32.totalorder %v351_v9, %v1564_v3  ;;  %vm352_vm3 = vcmp.eq.s32.totalorder %v347_v10, %v1564_v3  ;;  %v435_v22 = vsub.f32 %v433_v15, %v434_v20  ;;  %v309_v34 = vrot.slane %v302_v32, 4  ;;  %p1236_p6 = scmp.lt.s32.totalorder %s1614_s8, %s1234_s28  ;;  %p1237_p9 = scmp.lt.s32.totalorder %s1235_s9, %s1229_s5 }
  0x80   : > { %vm1571_vm4 = vmand %vm353_vm2, %vm294_vm1  ;;  %v1026_v14 = vsel %vm352_vm3, 1.0, %v1324_v1  ;;  %v306_v39 = vmax.f32 %v304_v35, %v305_v37  ;;  %p1232_p1 = pneg %p1231_p11 }
  0x81   : > { %v1027_v16 = vsel %vm1571_vm4, 1.0, %v1324_v1  ;;  %1030 = vmatprep.subr.msk.mxu0 %vm1571_vm4, %v1325_v17  ;;  %v450_v18 = vsub.f32 %v1026_v14, %v1026_v14  ;;  %1028 = vmatprep.subr.msk.mxu1 %vm1571_vm4, %v1325_v17  ;;  %v436_v25 = vand.u32 4294901760, %v435_v22  ;;  %v310_v36 = vmax.f32 %v302_v32, %v309_v34  ;;  %v844_v35 = vld [vmem:[%s1597_s18] sm:$0x3]  ;;  %p1238_p4 = por %p1237_p9, %p1236_p6 }
  0x82   : > { %v444_v19 = vsub.f32 %v1027_v16, %v1027_v16  ;;  %1031 = vmatpush1.msk.msra.mxu0 %vm352_vm3, %v1325_v17  ;;  %1029 = vmatpush1.msk.msra.mxu1 %vm352_vm3, %v1325_v17  ;;  %v307_v41 = vrot.slane %v306_v39, 1 }
  0x83   : > { %v451_v21 = vand.u32 4294901760, %v450_v18  ;;  %672 = vmatmul.mubr.f32.vlgmr.msra.gmra.mrb[0].mxu0 %v434_v20  ;;  %437 = vmatmul.mubr.f32.vlgmr.msra.gmra.mrb[0].mxu1 %v436_v25  ;;  %v311_v38 = vrot.slane %v310_v36, 2  ;;  %v1326_v20 = vmov 1966171168   ;;  %p1239_p12 = pnand %p1238_p4, %p1232_p1 }
  0x84   : > { %v445_v23 = vand.u32 4294901760, %v444_v19  ;;  %748 = vmatprep.mubr.f32.mxu0 %v1324_v1  ;;  %517 = vmatprep.mubr.f32.mxu1 %v1324_v1  ;;  %v308_v43 = vmax.f32 %v306_v39, %v307_v41 }
  0x85   : > { %v452_v24 = vsub.f32 %v450_v18, %v451_v21  ;;  %v312_v40 = vmax.f32 %v310_v36, %v311_v38 }
  0x86   : > { %v446_v26 = vsub.f32 %v444_v19, %v445_v23  ;;  %681 = vmatprep.subr.mxu0 %v445_v23  ;;  %v315_v45 = vsub.f32 %v295_v31, %v308_v43 }
  0x87   : > { %v453_v27 = vand.u32 4294901760, %v452_v24  ;;  %685 = vmatpush1.msra.mxu0 %v451_v21  ;;  %v313_v42 = vrot.slane %v312_v40, 1  ;;  %v849_v21 = vunpack.c.l.s4 %v1326_v20 }
  0x88   : > { %v447_v28 = vand.u32 4294901760, %v446_v26  ;;  %1032 = vmatprep.subr.msk.mxu0 %vm1571_vm4, %v1325_v17  ;;  %v317_v47 = vmul.f32 1.442695, %v315_v45 }
  0x89   : > { %v314_v44 = vmax.f32 %v312_v40, %v313_v42  ;;  %v850_v26 = vunpack.c.0.s8 %v849_v21 }
  0x8a   : > { %448 = vmatprep.subr.mxu1 %v447_v28  ;;  %1133 = vpow2.f32 %v317_v47 }
  0x8b   : > { %454 = vmatpush1.msra.mxu1 %v453_v27  ;;  %750 = vmatmul.mubr.f32.vlgmr.msra.gmra.mrb[0].mxu0 %v432_v12  ;;  %v316_v46 = vsub.f32 %v302_v32, %v314_v44 }
  0x8c   : > { %527 = vmatprep.subr.mxu1 %v444_v19  ;;  %1033 = vmatpush1.msk.msra.mxu0 %vm352_vm3, %v1325_v17 }
  0x8d   : > { %822 = vmatprep.mubr.f32.mxu0 %v1324_v1  ;;  %519 = vmatmul.mubr.f32.vlgmr.msra.gmra.mrb[0].mxu1 %v432_v12  ;;  %v319_v48 = vmul.f32 1.442695, %v316_v46 }
  0x8e   : > { %530 = vmatpush1.msra.mxu1 %v450_v18  ;;  %593 = vmatprep.mubr.f32.mxu1 %v1324_v1 }
  0x8f   : > { %1135 = vpow2.f32 %v319_v48 }
  0x93   : > { %824 = vmatmul.mubr.f32.vlgmr.msra.gmra.mrb[0].mxu0 %v432_v12 }
  0x94   : > { %v1134_v49 = vpop.eup %1133 }
  0x95   : > { %596 = vmatmul.mubr.f32.vlgmr.msra.gmra.mrb[0].mxu1 %v433_v15  ;;  %v321_v51 = vrot.slane %v1134_v49, 4 }
  0x97   : > { %v322_v53 = vadd.f32 %v1134_v49, %v321_v51 }
  0x99   : > { %v1136_v50 = vpop.eup %1135  ;;  %v323_v55 = vrot.slane %v322_v53, 2 }
  0x9a   : > { %v327_v52 = vrot.slane %v1136_v50, 4 }
  0x9b   : > { %v324_v57 = vadd.f32 %v323_v55, %v322_v53 }
  0x9c   : > { %v328_v54 = vadd.f32 %v1136_v50, %v327_v52 }
  0x9d   : > { %v325_v59 = vrot.slane %v324_v57, 1 }
  0x9e   : > { %v329_v56 = vrot.slane %v328_v54, 2 }
  0x9f   : > { %v326_v61 = vadd.f32 %v325_v59, %v324_v57 }
  0xa0   : > { %v330_v58 = vadd.f32 %v329_v56, %v328_v54 }
  0xa1   : > { %1137 = vlog2.f32 %v326_v61 }
  0xa2   : > { %v331_v60 = vrot.slane %v330_v58, 1 }
  0xa4   : > { %v332_v62 = vadd.f32 %v331_v60, %v330_v58 }
  0xa6   : > { %1139 = vlog2.f32 %v332_v62 }
  0xab   : > { %v1138_v63 = vpop.eup %1137 }
  0xac   : > { %v334_v1 = vmul.f32 0.6931472, %v1138_v63 }
  0xae   : > { %v337_v4 = vadd.f32 %v334_v1, %v308_v43 }
  0xb0   : > { %v1140_v0 = vpop.eup %1139  ;;  %v339_v8 = vsub.f32 %v295_v31, %v337_v4 }
  0xb1   : > { %v336_v2 = vmul.f32 0.6931472, %v1140_v0 }
  0xb3   : > { %v338_v6 = vadd.f32 %v336_v2, %v314_v44 }
  0xb5   : > { %v340_v10 = vsub.f32 %v302_v32, %v338_v6  ;;  %v853_v32 = vsub.s32 %v850_v26, %v1564_v3 }
 0x166   : > { %v825_v5 = vpop.f32.mrb[0].mxu0 }
 0x167   : > { %v827_v7 = vpop.f32.mrb[1].mxu0 }
 0x168   : > { %v597_v9 = vpop.f32.mrb[0].mxu1 }
 0x169   : > { %v1042_v11 = vadd.f32 %v825_v5, %v597_v9  ;;  %v599_v12 = vpop.f32.mrb[1].mxu1 }
 0x16a   : > { %v1043_v13 = vadd.f32 %v827_v7, %v599_v12 }
 0x16b   : > { %v830_v14 = vmul.f32 %v1042_v11, %v339_v8 }
 0x16c   : > { %v831_v15 = vmul.f32 %v1043_v13, %v340_v10 }
 0x16d   : > { %v832_v16 = vrot.slane %v830_v14, 4 }
 0x16e   : > { %v838_v17 = vrot.slane %v831_v15, 4 }
 0x16f   : > { %v833_v18 = vadd.f32 %v832_v16, %v830_v14 }
 0x170   : > { %v839_v19 = vadd.f32 %v838_v17, %v831_v15 }
 0x171   : > { %v834_v22 = vrot.slane %v833_v18, 2 }
 0x172   : > { %v840_v23 = vrot.slane %v839_v19, 2 }
 0x173   : > { %v835_v24 = vadd.f32 %v834_v22, %v833_v18 }
 0x174   : > { %v841_v25 = vadd.f32 %v840_v23, %v839_v19 }
 0x175   : > { %v836_v27 = vrot.slane %v835_v24, 1 }
 0x176   : > { %v842_v28 = vrot.slane %v841_v25, 1 }
 0x177   : > { %v837_v30 = vadd.f32 %v836_v27, %v835_v24 }
 0x178   : > { %v843_v31 = vadd.f32 %v842_v28, %v841_v25 }
 0x17a   : > { %v847_v33 = vcombine.low %v837_v30, %v843_v31 }
 0x17c   : > { %v854_v34 = vrot.slane %v847_v33, %v853_v32 }
 0x17e   : > { %v861_v36 = vrot.slane %v854_v34, %v853_v32 }
 0x180   : > { %v863_v37 = vadd.f32 %v861_v36, %v844_v35 }
 0x182   : > { %868 = vst.msk [vmem:[%s1597_s18] sm:$0x3] %vm1591_vm5, %v863_v37 }
 0x183   : > { %1242 = shalt.err (!%p1239_p12)
}
 0x184   : > { %s1243_s0 = scalar_lea.hbm %s1612_s7, 32  ;;  %s1247_s19 = scalar_lea.hbm %s1667_s3, 64 }
 0x185   : > { %p1244_p2 = scmp.ne.s32.totalorder %s1612_s7, %s1243_s0  ;;  %p1248_p3 = scmp.lt.u32.totalorder %s1612_s7, %s1667_s3 }
 0x186   : > { %p1249_p10 = scmp.lt.u32.totalorder %s1247_s19, %s1243_s0  ;;  %p1251_p7 = scmp.lt.u32.totalorder %s1243_s0, %s1612_s7 }
 0x187   : > { %p1245_p13 = pnand %p1244_p2, %p1693_p8 }
 0x188   : > { %p1250_p5 = por %p1249_p10, %p1248_p3 }
 0x189   : > { %p1246_p0 = pneg %p1245_p13 }
 0x18a   : > { %p1252_p11 = por %p1251_p7, %p1250_p5 }
 0x18c   : > { %p1253_p1 = pnand %p1252_p11, %p1246_p0 }
 0x18e   : > { %1256 = shalt.err (!%p1253_p1)
}
 0x18f   : > { %1060 = dma.vmem_to_hbm [thread:$0]  (%p1693_p8), %s1614_s8, 32, %s1612_s7, %s870_s25  }
 0x190 PF: > { %s898_s20 = sand.u32 1, %s1299_s12   ;;  %p1694_p6 = scmp.ne.s32.totalorder %s1675_s23, 0 }
 0x191   : > { %p1695_p9 = scmp.ge.s32.totalorder %s1319_s17, 2  ;;  %s899_s30 = scalar_lea.sflag [#allocation4], %s898_s20 }
 0x193   : > { %p1074_p4 = pnand %p1695_p9, %p1694_p6 }
 0x195   : > { %1294 = dma.done.wait (!%p1074_p4), %s899_s30, 32  }
 0x196   : > { %1296 = vsyncadd (!%p1074_p4), %s899_s30, 4294967264  ;;  %s22_s17 = sadd.s32 1, %s1319_s17   ;;  %s1696_s12 = smov %s1303_s13 }
 0x197   : > { %p19_p12 = scmp.ge.s32.totalorder %s22_s17, 4   ;;  %s1697_s13 = smov %s1307_s14 }
 0x198   : > { %s1698_s14 = smov %s1470_s26  ;;  %s1699_s15 = smov %s1315_s16 }
 0x199   : > { %s1700_s16 = smov %s1702_s27  ;;  %21 = sbr.rel (!%p19_p12) target bundleno = 10 (0xa), region = 98 }
 0x1a0   :  { %904 = vsyncpa [#allocation3], 1 }
 0x1a1   :  { %906 = vsyncpa [#allocation3 + $0x1], 1 }
 0x1a2   :  { %907 = vsyncpa [#allocation6], 1 }
 0x1a3   :  { %909 = vsyncpa [#allocation6 + $0x1], 1 }
 0x1a4   :  { %910 = vsyncpa [#allocation4], 1 }
 0x1a5   :  { %912 = vsyncpa [#allocation4 + $0x1], 1 }

</bundles_post_ra>
